<compile_context>
chip_gen: v7x
topology: tpu7x:2x2x1
jax: 0.10.0
libtpu: 0.0.40
codegen_flags: <defaults>
</compile_context>

<pallas_src>
import jax
import jax.numpy as jnp
from jax.experimental import pallas as pl
from jax.experimental.pallas import tpu as pltpu

ATTN_SIZE = 32          # attention_size
SEQ_LEN = 8             # seq_len
HIDDEN = 256
BATCH = 2
OUT_PAD = 128           # lane-dense padded score width (sliced back to SEQ_LEN)
IN_FEAT = SEQ_LEN * ATTN_SIZE          # 256 (== HIDDEN, so the packed slab is rectangular)
W_COLS = HIDDEN + HIDDEN + OUT_PAD     # 640
TILE_M = 256            # batch tile when B >= 256 (use 128 on v5e: 4x128^2 MXU)


def _round_up(n, m):
    return ((n + m - 1) // m) * m


def temporal_attention_kernel(x_ref, w_ref, b_ref, out_ref):
    # x_ref:   (tm, 256)     bf16   batch tile, lane-dense flattened (s*A + a)
    # w_ref:   (256, 640)    bf16   [ w_eff | w2 | w3_padded ]   (fc folded into w_eff)
    # b_ref:   (1, 640)      f32    [ b_eff | b2 | b3_padded ]
    # out_ref: (tm, OUT_PAD) f32
    x = x_ref[...]

    z1 = jnp.tanh(
        jnp.dot(x, w_ref[:, 0:HIDDEN], preferred_element_type=jnp.float32)
        + b_ref[:, 0:HIDDEN])
    z2 = jnp.tanh(
        jnp.dot(z1.astype(jnp.bfloat16), w_ref[:, HIDDEN:2 * HIDDEN],
                preferred_element_type=jnp.float32) + b_ref[:, HIDDEN:2 * HIDDEN])
    z3 = jnp.tanh(
        jnp.dot(z2.astype(jnp.bfloat16), w_ref[:, 2 * HIDDEN:W_COLS],
                preferred_element_type=jnp.float32) + b_ref[:, 2 * HIDDEN:W_COLS])

    # Softmax over the first SEQ_LEN lanes.  No max subtraction needed: z3 is
    # tanh-bounded in [-1, 1], so exp cannot overflow.  Padded lanes -> 0.
    lane = jax.lax.broadcasted_iota(jnp.int32, z3.shape, 1)
    e = jnp.where(lane < SEQ_LEN, jnp.exp(z3), jnp.float32(0.0))
    inv = pl.reciprocal(jnp.sum(e, axis=-1, keepdims=True), approx=True)
    out_ref[...] = (e * inv).astype(out_ref.dtype)


def prepare_weights(params):
    """Fold fc into attention[0] (exact: no activation between them), pad the last
    Linear to 128 lanes, concatenate everything into one bf16 weight slab and one
    f32 bias row.  Done once per weight set; reused for every forward call."""
    wfc, bfc, w1, b1, w2, b2, w3, b3 = params
    w1r = w1.reshape(SEQ_LEN, HIDDEN, HIDDEN)                       # per-timestep slabs
    # flat index of h.view(B,-1) is s*256 + j ; flat index of x.reshape(B,-1) is s*A + a
    w_eff = jnp.einsum('aj,sjo->sao', wfc, w1r).reshape(IN_FEAT, HIDDEN)
    b_eff = b1 + bfc @ w1r.sum(axis=0)
    w3p = jnp.zeros((HIDDEN, OUT_PAD), jnp.float32).at[:, :SEQ_LEN].set(w3)
    b3p = jnp.zeros((OUT_PAD,), jnp.float32).at[:SEQ_LEN].set(b3)
    w_cat = jnp.concatenate([w_eff, w2, w3p], axis=1).astype(jnp.bfloat16)   # (256, 640)
    b_cat = jnp.concatenate([b_eff, b2, b3p]).reshape(1, W_COLS).astype(jnp.float32)
    return w_cat, b_cat


@jax.jit
def temporal_attention(x, w_cat, b_cat):
    B = x.shape[0]
    assert x.shape[1:] == (SEQ_LEN, ATTN_SIZE)
    x_flat = x.reshape(B, IN_FEAT).astype(jnp.bfloat16)             # lane-dense (B, 256)

    # Batch tiling: small batches become one (8k, 256) tile; large batches are
    # pipelined over a parallel grid with the weight slab held resident.
    tm = TILE_M if B >= TILE_M else _round_up(B, 8)
    Bp = _round_up(B, tm)
    if Bp != B:
        x_flat = jnp.pad(x_flat, ((0, Bp - B), (0, 0)))
    grid = (Bp // tm,)

    out_pad = pl.pallas_call(
        temporal_attention_kernel,
        out_shape=jax.ShapeDtypeStruct((Bp, OUT_PAD), jnp.float32),
        grid=grid,
        in_specs=[
            pl.BlockSpec((tm, IN_FEAT), lambda i: (i, 0)),          # x: tiled over batch
            pl.BlockSpec((IN_FEAT, W_COLS), lambda i: (0, 0)),      # weights: resident
            pl.BlockSpec((1, W_COLS), lambda i: (0, 0)),            # biases:  resident
        ],
        out_specs=pl.BlockSpec((tm, OUT_PAD), lambda i: (i, 0)),
        compiler_params=pltpu.CompilerParams(
            dimension_semantics=("parallel",)),                     # v7x: both TCs
    )(x_flat, w_cat, b_cat)
    return out_pad[:B, :SEQ_LEN]


def make_params(key):
    """Deterministic init mimicking PyTorch nn.Linear default (U[-1/sqrt(fan_in), +...])."""
    def linear(key, fan_in, fan_out):
        k1, k2 = jax.random.split(key)
        bound = 1.0 / jnp.sqrt(fan_in)
        w = jax.random.uniform(k1, (fan_in, fan_out), jnp.float32, -bound, bound)
        b = jax.random.uniform(k2, (fan_out,), jnp.float32, -bound, bound)
        return w, b

    k = jax.random.split(key, 4)
    wfc, bfc = linear(k[0], ATTN_SIZE, HIDDEN)           # fc: Linear(attention_size, 256)
    w1, b1 = linear(k[1], HIDDEN * SEQ_LEN, HIDDEN)      # Linear(256*seq_len, 256)
    w2, b2 = linear(k[2], HIDDEN, HIDDEN)                # Linear(256, 256)
    w3, b3 = linear(k[3], HIDDEN, SEQ_LEN)               # Linear(256, seq_len)
    return wfc, bfc, w1, b1, w2, b2, w3, b3


def reference_f32(x, params):
    """Pure-JAX f32 reference mirroring the PyTorch forward."""
    wfc, bfc, w1, b1, w2, b2, w3, b3 = params
    B = x.shape[0]
    h = x @ wfc + bfc                       # (B, S, 256)
    flat = h.reshape(B, -1)                 # (B, S*256)
    z1 = jnp.tanh(flat @ w1 + b1)
    z2 = jnp.tanh(z1 @ w2 + b2)
    z3 = jnp.tanh(z2 @ w3 + b3)
    return jax.nn.softmax(z3, axis=-1)


def reference_quantized(x, w_cat, b_cat):
    """Mirrors the kernel math exactly (bf16 operands into each matmul, f32 accumulation)."""
    B = x.shape[0]
    w = w_cat.astype(jnp.float32)
    q = lambda a: a.astype(jnp.bfloat16).astype(jnp.float32)
    z1 = jnp.tanh(q(x.reshape(B, -1)) @ w[:, 0:HIDDEN] + b_cat[:, 0:HIDDEN])
    z2 = jnp.tanh(q(z1) @ w[:, HIDDEN:2 * HIDDEN] + b_cat[:, HIDDEN:2 * HIDDEN])
    z3 = jnp.tanh(q(z2) @ w[:, 2 * HIDDEN:W_COLS] + b_cat[:, 2 * HIDDEN:W_COLS])
    return jax.nn.softmax(z3[:, :SEQ_LEN], axis=-1)


if __name__ == "__main__":
    key = jax.random.PRNGKey(0)
    kx, kp, kb = jax.random.split(key, 3)
    params = make_params(kp)
    w_cat, b_cat = prepare_weights(params)      # fold + pack + bf16 cast, done once

    # Small-shape check (B=2, single grid point).
    x = jax.random.normal(kx, (BATCH, SEQ_LEN, ATTN_SIZE), jnp.float32)
    out = jax.block_until_ready(temporal_attention(x, w_cat, b_cat))
    assert out.shape == (BATCH, SEQ_LEN)
    ref_q = reference_quantized(x, w_cat, b_cat)
    ref_f = reference_f32(x, params)
    assert jnp.allclose(out, ref_q, atol=5e-3, rtol=5e-3), (out, ref_q)
    assert jnp.allclose(out, ref_f, atol=5e-2, rtol=5e-2), (out, ref_f)
    assert jnp.allclose(jnp.sum(out, axis=-1), 1.0, atol=5e-3)

    # Batched-grid check (exercises batch padding + multi-tile grid + resident weights).
    xb = jax.random.normal(kb, (300, SEQ_LEN, ATTN_SIZE), jnp.float32)
    outb = jax.block_until_ready(temporal_attention(xb, w_cat, b_cat))
    refb = reference_quantized(xb, w_cat, b_cat)
    assert outb.shape == (300, SEQ_LEN)
    assert jnp.allclose(outb, refb, atol=5e-3, rtol=5e-3)
    assert jnp.allclose(jnp.sum(outb, axis=-1), 1.0, atol=5e-3)

    print("KERNEL_OK")
</pallas_src>

<mosaic_0001>
module attributes {stable_mosaic.version = 11 : i64} {
  func.func @temporal_attention_kernel(%arg0: i32, %arg1: memref<8x256xbf16, #tpu.memory_space<vmem>>, %arg2: memref<256x640xbf16, #tpu.memory_space<vmem>>, %arg3: memref<1x640xf32, #tpu.memory_space<vmem>>, %arg4: memref<8x128xf32, #tpu.memory_space<vmem>>) attributes {dimension_semantics = [#tpu.dimension_semantics<parallel>], iteration_bounds = array<i64: 1>, scalar_prefetch = 0 : i64, scratch_operands = 0 : i64, tpu.core_type = #tpu.core_type<tc>, window_params = [{transform_indices = @transform_0, window_bounds = array<i64: 8, 256>}, {pipeline_mode = #tpu.pipeline_mode<synchronous>, transform_indices = @transform_1, window_bounds = array<i64: 256, 640>}, {pipeline_mode = #tpu.pipeline_mode<synchronous>, transform_indices = @transform_2, window_bounds = array<i64: 1, 640>}, {transform_indices = @transform_3, window_bounds = array<i64: 8, 128>}]} {
    %c0 = arith.constant 0 : index
    %c0_0 = arith.constant 0 : index
    %0 = vector.load %arg1[%c0, %c0_0] : memref<8x256xbf16, #tpu.memory_space<vmem>>, vector<8x256xbf16>
    %c0_1 = arith.constant 0 : index
    %c0_2 = arith.constant 0 : index
    %1 = vector.load %arg2[%c0_1, %c0_2] : memref<256x640xbf16, #tpu.memory_space<vmem>>, vector<256x256xbf16>
    %cst = arith.constant dense<0.000000e+00> : vector<8x256xf32>
    %2 = tpu.matmul %0, %1, %cst {dimension_numbers = #tpu.dot_dimension_numbers<[1], [0], [0], [1], [0, 0, 1, 1], [], []>} : vector<8x256xbf16>, vector<256x256xbf16>, vector<8x256xf32> -> vector<8x256xf32>
    %c0_3 = arith.constant 0 : index
    %c0_4 = arith.constant 0 : index
    %3 = vector.load %arg3[%c0_3, %c0_4] : memref<1x640xf32, #tpu.memory_space<vmem>>, vector<1x256xf32>
    %4 = vector.broadcast %3 : vector<1x256xf32> to vector<8x256xf32>
    %5 = arith.addf %2, %4 : vector<8x256xf32>
    %6 = math.tanh %5 : vector<8x256xf32>
    %7 = arith.truncf %6 : vector<8x256xf32> to vector<8x256xbf16>
    %c0_5 = arith.constant 0 : index
    %c256 = arith.constant 256 : index
    %8 = vector.load %arg2[%c0_5, %c256] : memref<256x640xbf16, #tpu.memory_space<vmem>>, vector<256x256xbf16>
    %cst_6 = arith.constant dense<0.000000e+00> : vector<8x256xf32>
    %9 = tpu.matmul %7, %8, %cst_6 {dimension_numbers = #tpu.dot_dimension_numbers<[1], [0], [0], [1], [0, 0, 1, 1], [], []>} : vector<8x256xbf16>, vector<256x256xbf16>, vector<8x256xf32> -> vector<8x256xf32>
    %c0_7 = arith.constant 0 : index
    %c256_8 = arith.constant 256 : index
    %10 = vector.load %arg3[%c0_7, %c256_8] : memref<1x640xf32, #tpu.memory_space<vmem>>, vector<1x256xf32>
    %11 = vector.broadcast %10 : vector<1x256xf32> to vector<8x256xf32>
    %12 = arith.addf %9, %11 : vector<8x256xf32>
    %13 = math.tanh %12 : vector<8x256xf32>
    %14 = arith.truncf %13 : vector<8x256xf32> to vector<8x256xbf16>
    %c0_9 = arith.constant 0 : index
    %c512 = arith.constant 512 : index
    %15 = vector.load %arg2[%c0_9, %c512] : memref<256x640xbf16, #tpu.memory_space<vmem>>, vector<256x128xbf16>
    %cst_10 = arith.constant dense<0.000000e+00> : vector<8x128xf32>
    %16 = tpu.matmul %14, %15, %cst_10 {dimension_numbers = #tpu.dot_dimension_numbers<[1], [0], [0], [1], [0, 0, 1, 1], [], []>} : vector<8x256xbf16>, vector<256x128xbf16>, vector<8x128xf32> -> vector<8x128xf32>
    %c0_11 = arith.constant 0 : index
    %c512_12 = arith.constant 512 : index
    %17 = vector.load %arg3[%c0_11, %c512_12] : memref<1x640xf32, #tpu.memory_space<vmem>>, vector<1x128xf32>
    %18 = vector.broadcast %17 : vector<1x128xf32> to vector<8x128xf32>
    %19 = arith.addf %16, %18 : vector<8x128xf32>
    %20 = math.tanh %19 : vector<8x128xf32>
    %21 = tpu.iota {dimensions = array<i32: 1>} : vector<8x128xi32>
    %c8_i32 = arith.constant 8 : i32
    %22 = vector.broadcast %c8_i32 : i32 to vector<8x128xi32>
    %23 = arith.cmpi slt, %21, %22 : vector<8x128xi32>
    %24 = math.exp %20 : vector<8x128xf32>
    %cst_13 = arith.constant 0.000000e+00 : f32
    %25 = vector.broadcast %cst_13 : f32 to vector<8x128xf32>
    %26 = arith.select %23, %24, %25 : vector<8x128xi1>, vector<8x128xf32>
    %cst_14 = arith.constant dense<0.000000e+00> : vector<8xf32>
    %27 = vector.multi_reduction <add>, %26, %cst_14 [1] : vector<8x128xf32> to vector<8xf32>
    %28 = vector.shape_cast %27 : vector<8xf32> to vector<8x1xf32>
    %29 = tpu.reciprocal %28 {approx = true} : vector<8x1xf32> -> vector<8x1xf32>
    %30 = vector.broadcast %29 : vector<8x1xf32> to vector<8x128xf32>
    %31 = arith.mulf %26, %30 : vector<8x128xf32>
    %c0_15 = arith.constant 0 : index
    %c0_16 = arith.constant 0 : index
    %32 = vector.load %arg4[%c0_15, %c0_16] : memref<8x128xf32, #tpu.memory_space<vmem>>, vector<8x128xf32>
    tpu.vector_store %arg4[%c0_15, %c0_16], %31 {strides = array<i32>} : memref<8x128xf32, #tpu.memory_space<vmem>>, vector<8x128xf32>,
    return
  }
  func.func @transform_0(%arg0: i32) -> (i32, i32) {
    %c0_i32 = arith.constant 0 : i32
    %c0_i32_0 = arith.constant 0 : i32
    return %arg0, %c0_i32 : i32, i32
  }
  func.func @transform_1(%arg0: i32) -> (i32, i32) {
    %c0_i32 = arith.constant 0 : i32
    %c0_i32_0 = arith.constant 0 : i32
    %c0_i32_1 = arith.constant 0 : i32
    return %c0_i32, %c0_i32_0 : i32, i32
  }
  func.func @transform_2(%arg0: i32) -> (i32, i32) {
    %c0_i32 = arith.constant 0 : i32
    %c0_i32_0 = arith.constant 0 : i32
    %c0_i32_1 = arith.constant 0 : i32
    return %c0_i32, %c0_i32_0 : i32, i32
  }
  func.func @transform_3(%arg0: i32) -> (i32, i32) {
    %c0_i32 = arith.constant 0 : i32
    %c0_i32_0 = arith.constant 0 : i32
    return %arg0, %c0_i32 : i32, i32
  }
}

</mosaic_0001>

<bundles_post_ra>
// kernel: temporal_attention.1
= control target key start
LH: loop header
LB: loop body
LE: loop exit
PB: predicated region body
PF: predicated region fallthrough
CT: control target
= control target key end

     0   :  { %8 = vsyncpa [#allocation3], 0  ;;  %s987_s12 = smov [#allocation2]   ;;  %s1045_s0 = inlined_call_operand.vmem [shape: bf16[8,256], index: 0, kind: input, shape index: {}]   ;;  %s1046_s1 = inlined_call_operand.hbm [shape: bf16[256,640], index: 1, kind: input, shape index: {}]   ;;  %s1047_s2 = inlined_call_operand.vmem [shape: f32[1,640], index: 2, kind: input, shape index: {}]   ;;  %s1048_s3 = inlined_call_operand.vmem [shape: f32[8,128], index: 3, kind: output, shape index: {}]  }
   0x1   :  { %s16_s13 = sshll.u32 %s987_s12, 4  ;;  %s963_s16 = scalar_lea.hbm %s1046_s1, 10240  ;;  %s17_s13 = int_to_ptr.vmem [resolvable:$true] %s16_s13 }
   0x2   :  { %p964_p0 = scmp.ne.s32.totalorder %s1046_s1, %s963_s16  ;;  %p967_p1 = scmp.lt.u32.totalorder %s963_s16, %s1046_s1 }
   0x4   :  { %p969_p2 = pnand %p967_p1, %p964_p0 }
   0x6   :  { %972 = shalt.err (!%p969_p2)
}
   0x7   :  { %s973_s21 = scalar_lea.vmem %s17_s13, 10240  ;;  %p978_p4 = scmp.lt.s32.totalorder %s17_s13, %s17_s13 }
   0x8   :  { %p974_p3 = scmp.ne.s32.totalorder %s17_s13, %s973_s21  ;;  %p979_p5 = scmp.lt.s32.totalorder %s973_s21, %s973_s21 }
   0xa   :  { %p980_p6 = por %p979_p5, %p978_p4 }
   0xc   :  { %p981_p7 = pnand %p980_p6, %p974_p3 }
   0xe   :  { %984 = shalt.err (!%p981_p7)
}
   0xf   :  { %s988_s22 = smov 320   ;;  %s989_s23 = smov 20  }
  0x10   :  { %22 = dma.hbm_to_vmem [thread:$0]  %s1046_s1, 10240, %s17_s13, [#allocation3], %s988_s22, %s988_s22, %s989_s23  }
  0x11   :  { %985 = dma.done.wait [#allocation3], 10240  }
  0x12   :  { %986 = vsyncadd [#allocation3], 4294957056  ;;  %v835_v0 = vld [vmem:[#allocation2 + $0x4] ss:$20 sps:$4 sm:$0xff]   ;;  %v837_v1 = vld [vmem:[#allocation2] ss:$20 sps:$4 sm:$0xff]  }
  0x13   :  { %241 = vmatprep.subr.bf16.mxu0 %v835_v0  ;;  %v838_v2 = vld [vmem:[#allocation2 + $0x2c] ss:$20 sps:$4 sm:$0xff]   ;;  %v840_v3 = vld [vmem:[#allocation2 + $0x28] ss:$20 sps:$4 sm:$0xff]   ;;  %v843_v5 = vld [vmem:[#allocation2 + $0x50] ss:$20 sps:$4 sm:$0xff]  }
  0x14   :  { %242 = vmatpush1.bf16.msra.mxu0 %v837_v1  ;;  %v841_v4 = vld [vmem:[#allocation2 + $0x54] ss:$20 sps:$4 sm:$0xff]   ;;  %v844_v6 = vld [vmem:[#allocation2 + $0x7c] ss:$20 sps:$4 sm:$0xff]   ;;  %v846_v7 = vld [vmem:[#allocation2 + $0x78] ss:$20 sps:$4 sm:$0xff]  }
  0x15   :  { %243 = vmatprep.subr.bf16.mxu0 %v838_v2  ;;  %v847_v8 = vld [vmem:[#allocation2 + $0xa4] ss:$20 sps:$4 sm:$0xff]   ;;  %v849_v9 = vld [vmem:[#allocation2 + $0xa0] ss:$20 sps:$4 sm:$0xff]   ;;  %v852_v11 = vld [vmem:[#allocation2 + $0xc8] ss:$20 sps:$4 sm:$0xff]  }
  0x16   :  { %v850_v10 = vld [vmem:[#allocation2 + $0xcc] ss:$20 sps:$4 sm:$0xff]   ;;  %v853_v12 = vld [vmem:[#allocation2 + $0xf4] ss:$20 sps:$4 sm:$0xff]   ;;  %v855_v13 = vld [vmem:[#allocation2 + $0xf0] ss:$20 sps:$4 sm:$0xff]  }
  0x17   :  { %v1025_v14 = vld [vmem:[%s1045_s0] sm:$0xff]  ;;  %v887_v17 = vld [vmem:[#allocation2 + $0x8] ss:$20 sps:$4 sm:$0xff]   ;;  %v858_v20 = vld [vmem:[#allocation2 + $0x118] ss:$20 sps:$4 sm:$0xff]  }
  0x18   :  { %244 = vmatpush1.bf16.msra.mxu0 %v840_v3  ;;  %v728_v15 = vcombine.high %v1025_v14, %v1025_v14  ;;  %v885_v16 = vld [vmem:[#allocation2 + $0xc] ss:$20 sps:$4 sm:$0xff]   ;;  %v888_v18 = vld [vmem:[#allocation2 + $0x34] ss:$20 sps:$4 sm:$0xff]   ;;  %v856_v19 = vld [vmem:[#allocation2 + $0x11c] ss:$20 sps:$4 sm:$0xff]   ;;  %v727_v55 = vcombine.low %v1025_v14, %v1025_v14 }
  0x19   :  { %245 = vmatprep.subr.bf16.mxu0 %v841_v4  ;;  %490 = vmatprep.subr.bf16.mxu1 %v885_v16  ;;  %v890_v21 = vld [vmem:[#allocation2 + $0x30] ss:$20 sps:$4 sm:$0xff]   ;;  %v861_v24 = vld [vmem:[#allocation2 + $0x140] ss:$20 sps:$4 sm:$0xff]   ;;  %v893_v25 = vld [vmem:[#allocation2 + $0x58] ss:$20 sps:$4 sm:$0xff]  }
  0x1a   :  { %273 = vmatprep.mubr.bf16.mxu0 %v728_v15  ;;  %491 = vmatpush1.bf16.msra.mxu1 %v887_v17  ;;  %v891_v22 = vld [vmem:[#allocation2 + $0x5c] ss:$20 sps:$4 sm:$0xff]   ;;  %v859_v23 = vld [vmem:[#allocation2 + $0x144] ss:$20 sps:$4 sm:$0xff]   ;;  %v862_v27 = vld [vmem:[#allocation2 + $0x16c] ss:$20 sps:$4 sm:$0xff]  }
  0x1b   :  { %492 = vmatprep.subr.bf16.mxu1 %v888_v18  ;;  %v894_v26 = vld [vmem:[#allocation2 + $0x84] ss:$20 sps:$4 sm:$0xff]   ;;  %v864_v28 = vld [vmem:[#allocation2 + $0x168] ss:$20 sps:$4 sm:$0xff]   ;;  %v896_v29 = vld [vmem:[#allocation2 + $0x80] ss:$20 sps:$4 sm:$0xff]  }
  0x1c   :  { %246 = vmatpush1.bf16.msra.mxu0 %v843_v5  ;;  %v897_v30 = vld [vmem:[#allocation2 + $0xac] ss:$20 sps:$4 sm:$0xff]   ;;  %v865_v31 = vld [vmem:[#allocation2 + $0x194] ss:$20 sps:$4 sm:$0xff]   ;;  %v867_v32 = vld [vmem:[#allocation2 + $0x190] ss:$20 sps:$4 sm:$0xff]  }
  0x1d   :  { %247 = vmatprep.subr.bf16.mxu0 %v844_v6  ;;  %v899_v33 = vld [vmem:[#allocation2 + $0xa8] ss:$20 sps:$4 sm:$0xff]   ;;  %v902_v36 = vld [vmem:[#allocation2 + $0xd0] ss:$20 sps:$4 sm:$0xff]   ;;  %v870_v37 = vld [vmem:[#allocation2 + $0x1b8] ss:$20 sps:$4 sm:$0xff]  }
  0x1e   :  { %493 = vmatpush1.bf16.msra.mxu1 %v890_v21  ;;  %v900_v34 = vld [vmem:[#allocation2 + $0xd4] ss:$20 sps:$4 sm:$0xff]   ;;  %v868_v35 = vld [vmem:[#allocation2 + $0x1bc] ss:$20 sps:$4 sm:$0xff]   ;;  %v871_v39 = vld [vmem:[#allocation2 + $0x1e4] ss:$20 sps:$4 sm:$0xff]  }
  0x1f   :  { %494 = vmatprep.subr.bf16.mxu1 %v891_v22  ;;  %v903_v38 = vld [vmem:[#allocation2 + $0xfc] ss:$20 sps:$4 sm:$0xff]   ;;  %v905_v40 = vld [vmem:[#allocation2 + $0xf8] ss:$20 sps:$4 sm:$0xff]   ;;  %v873_v41 = vld [vmem:[#allocation2 + $0x1e0] ss:$20 sps:$4 sm:$0xff]  }
  0x20   :  { %248 = vmatpush1.bf16.msra.mxu0 %v846_v7  ;;  %v906_v42 = vld [vmem:[#allocation2 + $0x124] ss:$20 sps:$4 sm:$0xff]   ;;  %v874_v43 = vld [vmem:[#allocation2 + $0x20c] ss:$20 sps:$4 sm:$0xff]   ;;  %v876_v45 = vld [vmem:[#allocation2 + $0x208] ss:$20 sps:$4 sm:$0xff]  }
  0x21   :  { %249 = vmatprep.subr.bf16.mxu0 %v847_v8  ;;  %v908_v44 = vld [vmem:[#allocation2 + $0x120] ss:$20 sps:$4 sm:$0xff]   ;;  %v911_v48 = vld [vmem:[#allocation2 + $0x148] ss:$20 sps:$4 sm:$0xff]   ;;  %v879_v49 = vld [vmem:[#allocation2 + $0x230] ss:$20 sps:$4 sm:$0xff]  }
  0x22   :  { %495 = vmatpush1.bf16.msra.mxu1 %v893_v25  ;;  %v909_v46 = vld [vmem:[#allocation2 + $0x14c] ss:$20 sps:$4 sm:$0xff]   ;;  %v877_v47 = vld [vmem:[#allocation2 + $0x234] ss:$20 sps:$4 sm:$0xff]   ;;  %v880_v51 = vld [vmem:[#allocation2 + $0x25c] ss:$20 sps:$4 sm:$0xff]  }
  0x23   :  { %496 = vmatprep.subr.bf16.mxu1 %v894_v26  ;;  %v912_v50 = vld [vmem:[#allocation2 + $0x174] ss:$20 sps:$4 sm:$0xff]   ;;  %v914_v52 = vld [vmem:[#allocation2 + $0x170] ss:$20 sps:$4 sm:$0xff]   ;;  %v882_v53 = vld [vmem:[#allocation2 + $0x258] ss:$20 sps:$4 sm:$0xff]  }
  0x24   :  { %250 = vmatpush1.bf16.msra.mxu0 %v849_v9  ;;  %v915_v54 = vld [vmem:[#allocation2 + $0x19c] ss:$20 sps:$4 sm:$0xff]   ;;  %v917_v56 = vld [vmem:[#allocation2 + $0x198] ss:$20 sps:$4 sm:$0xff]   ;;  %v920_v58 = vld [vmem:[#allocation2 + $0x1c0] ss:$20 sps:$4 sm:$0xff]  }
  0x25   :  { %251 = vmatprep.subr.bf16.mxu0 %v850_v10  ;;  %v918_v57 = vld [vmem:[#allocation2 + $0x1c4] ss:$20 sps:$4 sm:$0xff]   ;;  %v921_v59 = vld [vmem:[#allocation2 + $0x1ec] ss:$20 sps:$4 sm:$0xff]   ;;  %v923_v60 = vld [vmem:[#allocation2 + $0x1e8] ss:$20 sps:$4 sm:$0xff]  }
  0x26   :  { %497 = vmatpush1.bf16.msra.mxu1 %v896_v29  ;;  %v924_v61 = vld [vmem:[#allocation2 + $0x214] ss:$20 sps:$4 sm:$0xff]   ;;  %v926_v62 = vld [vmem:[#allocation2 + $0x210] ss:$20 sps:$4 sm:$0xff]   ;;  %v929_v0 = vld [vmem:[#allocation2 + $0x238] ss:$20 sps:$4 sm:$0xff]  }
  0x27   :  { %498 = vmatprep.subr.bf16.mxu1 %v897_v30  ;;  %v927_v63 = vld [vmem:[#allocation2 + $0x23c] ss:$20 sps:$4 sm:$0xff]   ;;  %v930_v1 = vld [vmem:[#allocation2 + $0x264] ss:$20 sps:$4 sm:$0xff]   ;;  %v932_v2 = vld [vmem:[#allocation2 + $0x260] ss:$20 sps:$4 sm:$0xff]  }
  0x28   :  { %252 = vmatpush1.bf16.msra.mxu0 %v852_v11  ;;  %v933_v3 = vld [vmem:[#allocation2 + $0x150] ss:$20 sps:$4 sm:$0xff]   ;;  %v935_v5 = vld [vmem:[#allocation2 + $0x178] ss:$20 sps:$4 sm:$0xff]   ;;  %v937_v7 = vld [vmem:[#allocation2 + $0x1a0] ss:$20 sps:$4 sm:$0xff]   ;;  %v64_v11 = vlaneseq }
  0x29   :  { %253 = vmatprep.subr.bf16.mxu0 %v853_v12  ;;  %v934_v4 = vld [vmem:[#allocation2 + $0x10] ss:$20 sps:$4 sm:$0xff]   ;;  %v936_v6 = vld [vmem:[#allocation2 + $0x38] ss:$20 sps:$4 sm:$0xff]   ;;  %v938_v8 = vld [vmem:[#allocation2 + $0x60] ss:$20 sps:$4 sm:$0xff]  }
  0x2a   :  { %499 = vmatpush1.bf16.msra.mxu1 %v899_v33  ;;  %v939_v9 = vld [vmem:[#allocation2 + $0x1c8] ss:$20 sps:$4 sm:$0xff]   ;;  %v65_v12 = vshrl.u32 %v64_v11, 7  ;;  %v62_v14 = vld [vmem:[%s1047_s2] sm:$0x3] }
  0x2b   :  { %500 = vmatprep.subr.bf16.mxu1 %v900_v34  ;;  %v940_v10 = vld [vmem:[#allocation2 + $0x88] ss:$20 sps:$4 sm:$0xff]   ;;  %v942_v29 = vld [vmem:[#allocation2 + $0xb0] ss:$20 sps:$4 sm:$0xff]   ;;  %v943_v30 = vld [vmem:[#allocation2 + $0x218] ss:$20 sps:$4 sm:$0xff]  }
  0x2c   :  { %254 = vmatpush1.bf16.msra.mxu0 %v855_v13  ;;  %v66_v13 = vsub.s32 0, %v65_v12  ;;  %v70_v15 = vsub.s32 1, %v65_v12  ;;  %v946_v33 = vld [vmem:[#allocation2 + $0x100] ss:$20 sps:$4 sm:$0xff]   ;;  %v947_v34 = vld [vmem:[#allocation2 + $0x268] ss:$20 sps:$4 sm:$0xff]  }
  0x2d   :  { %255 = vmatprep.subr.bf16.mxu0 %v856_v19 }
  0x2e   :  { %501 = vmatpush1.bf16.msra.mxu1 %v902_v36  ;;  %v67_v16 = vrot.slane %v62_v14, %v66_v13  ;;  %v71_v17 = vrot.slane %v62_v14, %v70_v15  ;;  %v318_v36 = vld [vmem:[%s1047_s2 + $0x2] sm:$0x3] }
  0x2f   :  { %502 = vmatprep.subr.bf16.mxu1 %v903_v38  ;;  %v327_v38 = vrot.slane %v318_v36, %v70_v15 }
  0x30   :  { %256 = vmatpush1.bf16.msra.mxu0 %v858_v20 }
  0x31   :  { %257 = vmatprep.subr.bf16.mxu0 %v859_v23 }
  0x32   :  { %503 = vmatpush1.bf16.msra.mxu1 %v905_v40 }
  0x33   :  { %504 = vmatprep.subr.bf16.mxu1 %v906_v42 }
  0x34   :  { %258 = vmatpush1.bf16.msra.mxu0 %v861_v24 }
  0x35   :  { %259 = vmatprep.subr.bf16.mxu0 %v862_v27 }
  0x36   :  { %505 = vmatpush1.bf16.msra.mxu1 %v908_v44 }
  0x37   :  { %506 = vmatprep.subr.bf16.mxu1 %v909_v46 }
  0x38   :  { %260 = vmatpush1.bf16.msra.mxu0 %v864_v28  ;;  %v941_v28 = vld [vmem:[#allocation2 + $0x1f0] ss:$20 sps:$4 sm:$0xff]  }
  0x39   :  { %261 = vmatprep.subr.bf16.mxu0 %v865_v31  ;;  %v944_v31 = vld [vmem:[#allocation2 + $0xd8] ss:$20 sps:$4 sm:$0xff]  }
  0x3a   :  { %507 = vmatpush1.bf16.msra.mxu1 %v911_v48 }
  0x3b   :  { %508 = vmatprep.subr.bf16.mxu1 %v912_v50  ;;  %v793_v50 = vld [vmem:[%s1047_s2 + $0x4] ss:$0 sm:$0xff] }
  0x3c   :  { %262 = vmatpush1.bf16.msra.mxu0 %v867_v32  ;;  %v945_v32 = vld [vmem:[#allocation2 + $0x240] ss:$20 sps:$4 sm:$0xff]  }
  0x3d   :  { %263 = vmatprep.subr.bf16.mxu0 %v868_v35  ;;  %v948_v35 = vld [vmem:[#allocation2 + $0x128] ss:$20 sps:$4 sm:$0xff]  }
  0x3e   :  { %509 = vmatpush1.bf16.msra.mxu1 %v914_v52 }
  0x3f   :  { %510 = vmatprep.subr.bf16.mxu1 %v915_v54 }
  0x40   :  { %264 = vmatpush1.bf16.msra.mxu0 %v870_v37  ;;  %v323_v37 = vrot.slane %v318_v36, %v66_v13 }
  0x41   :  { %265 = vmatprep.subr.bf16.mxu0 %v871_v39 }
  0x42   :  { %511 = vmatpush1.bf16.msra.mxu1 %v917_v56 }
  0x43   :  { %512 = vmatprep.subr.bf16.mxu1 %v918_v57 }
  0x44   :  { %266 = vmatpush1.bf16.msra.mxu0 %v873_v41 }
  0x45   :  { %267 = vmatprep.subr.bf16.mxu0 %v874_v43 }
  0x46   :  { %513 = vmatpush1.bf16.msra.mxu1 %v920_v58  ;;  %v712_v58 = vand.u32 127, %v64_v11 }
  0x47   :  { %514 = vmatprep.subr.bf16.mxu1 %v921_v59 }
  0x48   :  { %268 = vmatpush1.bf16.msra.mxu0 %v876_v45  ;;  %vm713_vm0 = vcmp.lt.s32.totalorder %v712_v58, 8 }
  0x49   :  { %269 = vmatprep.subr.bf16.mxu0 %v877_v47 }
  0x4a   :  { %515 = vmatpush1.bf16.msra.mxu1 %v923_v60 }
  0x4b   :  { %516 = vmatprep.subr.bf16.mxu1 %v924_v61 }
  0x4c   :  { %270 = vmatpush1.bf16.msra.mxu0 %v879_v49 }
  0x4d   :  { %271 = vmatprep.subr.bf16.mxu0 %v880_v51 }
  0x4e   :  { %517 = vmatpush1.bf16.msra.mxu1 %v926_v62 }
  0x4f   :  { %518 = vmatprep.subr.bf16.mxu1 %v927_v63 }
  0x50   :  { %272 = vmatpush1.bf16.msra.mxu0 %v882_v53 }
  0x51   :  { %810 = vmatprep.subr.bf16.mxu0 %v933_v3 }
  0x52   :  { %519 = vmatpush1.bf16.msra.mxu1 %v929_v0 }
  0x53   :  { %274 = vmatmul.mubr.bf16.vlgmr.msra.gmra.mrb[0].mxu0 %v727_v55  ;;  %520 = vmatprep.subr.bf16.mxu1 %v930_v1 }
  0x54   :  { %811 = vmatpush3.bf16.msra.mxu0 %v934_v4 }
  0x55   :  { %812 = vmatprep.subr.bf16.mxu0 %v935_v5 }
  0x56   :  { %521 = vmatpush1.bf16.msra.mxu1 %v932_v2 }
  0x58   :  { %813 = vmatpush3.bf16.msra.mxu0 %v936_v6 }
  0x59   :  { %814 = vmatprep.subr.bf16.mxu0 %v937_v7 }
  0x5c   :  { %815 = vmatpush3.bf16.msra.mxu0 %v938_v8 }
  0x5d   :  { %816 = vmatprep.subr.bf16.mxu0 %v939_v9 }
  0x60   :  { %817 = vmatpush3.bf16.msra.mxu0 %v940_v10 }
  0x61   :  { %818 = vmatprep.subr.bf16.mxu0 %v941_v28 }
  0x64   :  { %819 = vmatpush3.bf16.msra.mxu0 %v942_v29 }
  0x65   :  { %820 = vmatprep.subr.bf16.mxu0 %v943_v30 }
  0x68   :  { %821 = vmatpush3.bf16.msra.mxu0 %v944_v31 }
  0x69   :  { %822 = vmatprep.subr.bf16.mxu0 %v945_v32 }
  0x6c   :  { %823 = vmatpush3.bf16.msra.mxu0 %v946_v33 }
  0x6d   :  { %824 = vmatprep.subr.bf16.mxu0 %v947_v34 }
  0x70   :  { %825 = vmatpush3.bf16.msra.mxu0 %v948_v35 }
 0x126   :  { %v275_v18 = vpop.f32.mrb[0].mxu0 }
 0x127   :  { %v276_v19 = vadd.f32 %v275_v18, %v67_v16  ;;  %v277_v20 = vpop.f32.mrb[1].mxu0 }
 0x128   :  { %v278_v21 = vadd.f32 %v277_v20, %v71_v17  ;;  %v279_v22 = vpop.f32.mrb[2].mxu0 }
 0x129   :  { %949 = vtanh.f32 %v276_v19  ;;  %v280_v23 = vpop.f32.mrb[3].mxu0 }
 0x12a   :  { %951 = vtanh.f32 %v278_v21 }
 0x133   :  { %v950_v24 = vpop.eup %949 }
 0x134   :  { %v952_v25 = vpop.eup %951  ;;  %v284_v27 = vpack.c.bf16 %v950_v24, %v950_v24 }
 0x135   :  { %v285_v26 = vpack.c.bf16 %v952_v25, %v952_v25 }
 0x137   :  { %522 = vmatprep.mubr.bf16.mxu1 %v285_v26 }
 0x138   :  { %523 = vmatmul.mubr.bf16.vlgmr.msra.gmra.mrb[0].mxu1 %v284_v27 }
 0x20b   :  { %v524_v39 = vpop.f32.mrb[0].mxu1 }
 0x20c   :  { %v525_v40 = vadd.f32 %v524_v39, %v323_v37  ;;  %v526_v41 = vpop.f32.mrb[1].mxu1 }
 0x20d   :  { %v527_v42 = vadd.f32 %v526_v41, %v327_v38  ;;  %v528_v43 = vpop.f32.mrb[2].mxu1 }
 0x20e   :  { %953 = vtanh.f32 %v525_v40  ;;  %v529_v44 = vpop.f32.mrb[3].mxu1 }
 0x20f   :  { %955 = vtanh.f32 %v527_v42 }
 0x218   :  { %v954_v45 = vpop.eup %953 }
 0x219   :  { %v956_v46 = vpop.eup %955  ;;  %v533_v48 = vpack.c.bf16 %v954_v45, %v954_v45 }
 0x21a   :  { %v534_v47 = vpack.c.bf16 %v956_v46, %v956_v46 }
 0x21c   :  { %702 = vmatprep.mubr.bf16.mxu0 %v534_v47 }
 0x21d   :  { %703 = vmatmul.mubr.bf16.vlgmr.msra.gmra.mrb[4].mxu0 %v533_v48 }
 0x2f0   :  { %v826_v49 = vpop.f32.mrb[4].mxu0 }
 0x2f1   :  { %v827_v51 = vpop.f32.mrb[5].mxu0 }
 0x2f2   :  { %v828_v52 = vadd.f32 %v827_v51, %v826_v49  ;;  %v829_v53 = vpop.f32.mrb[6].mxu0 }
 0x2f3   :  { %v830_v54 = vpop.f32.mrb[7].mxu0 }
 0x2f4   :  { %v705_v55 = vadd.f32 %v828_v52, %v793_v50 }
 0x2f6   :  { %957 = vtanh.f32 %v705_v55 }
 0x300   :  { %v958_v56 = vpop.eup %957 }
 0x301   :  { %v714_v57 = vmul.f32 1.442695, %v958_v56 }
 0x303   :  { %959 = vpow2.f32 %v714_v57 }
 0x30d   :  { %v960_v59 = vpop.eup %959 }
 0x30e   :  { %v716_v60 = vsel %vm713_vm0, %v960_v59, 0.0 }
 0x30f   :  { %717 = vadd.xlane.f32.xlu0 %v716_v60 }
 0x39c   :  { %v718_v61 = vpop.xlane.xlu0 %717 }
 0x39d   :  { %961 = vrcp.f32 %v718_v61 }
 0x3a7   :  { %v962_v62 = vpop.eup %961 }
 0x3a8   :  { %v720_v63 = vmul.f32 %v962_v62, %v716_v60 }
 0x3aa   :  { %721 = vst [vmem:[%s1048_s3] sm:$0xff] %v720_v63 }
 0x3ab   :  { %726 = vsyncpa [#allocation3], 1 }

</bundles_post_ra>
